<compile_context>
chip_gen: v5e
topology: v5e:2x2
jax: 0.10.0
libtpu: 0.0.40
codegen_flags: <defaults>
</compile_context>

<pallas_src>
import functools

import jax
import jax.numpy as jnp
from jax import lax
from jax.experimental import pallas as pl
from jax.experimental.pallas import tpu as pltpu

LANE = 128  # TPU lane width


def _round_up(x, m):
    return ((x + m - 1) // m) * m


def _affine_kernel(x_ref, w_ref, b_ref, o_ref):
    """o = x @ w + b for one batch tile.

    x_ref: (rows_tile, K) f32 VMEM   (K = 128 in the lane-dense path)
    w_ref: (K, N)        f32 VMEM    (block-diagonal S in the lane-dense path)
    b_ref: (1, 1)        f32 SMEM    (collapsed bias, scalar path)
    o_ref: (rows_tile, N) f32 VMEM
    """
    y = jnp.dot(
        x_ref[...],
        w_ref[...],
        preferred_element_type=jnp.float32,
        precision=lax.Precision.HIGHEST,  # full-f32 MXU passes (accuracy)
    )
    o_ref[...] = (y + b_ref[0, 0]).astype(o_ref.dtype)


def _forward_lane_dense(x, w_eff, b_eff, batch_tile):
    """in_size <= 128: lane-dense slab + block-diagonal MXU contraction."""
    B, in_size = x.shape
    F = pl.next_power_of_2(in_size)  # divisor of 128
    G = LANE // F                    # batch rows packed per 128-lane row

    # ---- batch tiling (units of lane-dense x rows) --------------------------
    batch_tile = max(_round_up(batch_tile, 8 * G), 8 * G)
    R = pl.cdiv(B, G)                               # lane-dense rows needed
    rows_tile = min(batch_tile // G, _round_up(R, 8))
    rows_tile = min(rows_tile, 8192)                # cap x tile at 4 MiB/step
    if R * LANE * 4 >= (2 << 20):                   # big batch: >=4 grid steps
        rows_tile = min(rows_tile, _round_up(pl.cdiv(R, 4), 8))  # v7x 2-TC balance
    rows_tile = max(rows_tile, 8)
    Rp = _round_up(R, rows_tile)
    Bp = Rp * G
    grid = (Rp // rows_tile,)

    # ---- lane-dense x slab: (Bp, F) -> (Rp, 128), zero padded ---------------
    x = jnp.pad(x, ((0, Bp - B), (0, F - in_size)))
    x2d = x.reshape(Rp, LANE)                       # free row-major reshape

    # Block-diagonal contraction matrix: S[g*F + p, g] = W_eff[p].
    w_col = jnp.pad(w_eff, ((0, F - in_size), (0, 0)))       # (F, 1)
    s_mat = jnp.kron(jnp.eye(G, dtype=jnp.float32), w_col)   # (128, G)

    # VMEM budget: x tile + lane-padded out tile, double buffered.
    vmem_est = 4 * (rows_tile * LANE * 4) + LANE * LANE * 4 + (1 << 20)
    cp = dict(dimension_semantics=("parallel",))
    if vmem_est > (12 << 20):                       # v5e scoped default 16 MiB
        cp["vmem_limit_bytes"] = min(vmem_est + (4 << 20), 48 << 20)

    out = pl.pallas_call(
        _affine_kernel,
        out_shape=jax.ShapeDtypeStruct((Rp, G), jnp.float32),
        grid_spec=pltpu.PrefetchScalarGridSpec(
            num_scalar_prefetch=0,
            grid=grid,
            in_specs=[
                pl.BlockSpec((rows_tile, LANE), lambda i: (i, 0)),   # lane-dense x
                pl.BlockSpec((LANE, G), lambda i: (0, 0)),           # S (constant)
                pl.BlockSpec(memory_space=pltpu.MemorySpace.SMEM),   # b_eff scalar
            ],
            out_specs=pl.BlockSpec((rows_tile, G), lambda i: (i, 0)),
        ),
        compiler_params=pltpu.CompilerParams(**cp),
    )(x2d, s_mat, b_eff)

    # (Rp, G) flattens row-major to batch order; drop padded rows.
    return out.reshape(Bp, 1)[:B]


def _forward_wide(x, w_eff, b_eff, batch_tile):
    """Fallback for in_size > 128: batch-tiled GEMV on the MXU."""
    B, in_size = x.shape
    F = _round_up(in_size, LANE)
    rows_target = max(8, _round_up((2 << 20) // (F * 4), 8))   # ~2 MiB x / step
    rows_tile = min(_round_up(B, 8), rows_target, max(8, _round_up(batch_tile, 8)))
    Bp = _round_up(B, rows_tile)
    grid = (Bp // rows_tile,)

    x = jnp.pad(x, ((0, Bp - B), (0, F - in_size)))
    w_col = jnp.pad(w_eff, ((0, F - in_size), (0, 0)))         # (F, 1)

    vmem_est = (2 * rows_tile * F * 4) + (2 * rows_tile * LANE * 4) \
        + F * LANE * 4 + (1 << 20)
    cp = dict(dimension_semantics=("parallel",))
    if vmem_est > (12 << 20):
        cp["vmem_limit_bytes"] = min(vmem_est + (4 << 20), 48 << 20)

    out = pl.pallas_call(
        _affine_kernel,
        out_shape=jax.ShapeDtypeStruct((Bp, 1), jnp.float32),
        grid_spec=pltpu.PrefetchScalarGridSpec(
            num_scalar_prefetch=0,
            grid=grid,
            in_specs=[
                pl.BlockSpec((rows_tile, F), lambda i: (i, 0)),
                pl.BlockSpec((F, 1), lambda i: (0, 0)),
                pl.BlockSpec(memory_space=pltpu.MemorySpace.SMEM),
            ],
            out_specs=pl.BlockSpec((rows_tile, 1), lambda i: (i, 0)),
        ),
        compiler_params=pltpu.CompilerParams(**cp),
    )(x, w_col, b_eff)
    return out[:B]


@functools.partial(jax.jit, static_argnames=("batch_tile",))
def linear_nn_forward(x, params, batch_tile=32768):
    """Forward pass of LinearNN. x: [B, input_size] f32 -> [B, 1] f32."""
    w1, b1, w2, b2, w3, b3 = params
    _, in_size = x.shape

    # Collapse the activation-free 3-layer chain into one affine map (f32).
    w_eff = w1 @ w2 @ w3                      # (in_size, 1)
    b_eff = b1 @ w2 @ w3 + b2 @ w3 + b3       # (1, 1)

    if in_size <= LANE:
        return _forward_lane_dense(x, w_eff, b_eff, batch_tile)
    return _forward_wide(x, w_eff, b_eff, batch_tile)


def init_linear_nn_params(key, input_size, dtype=jnp.float32):
    """Mirror nn.Linear's default U(-1/sqrt(fan_in), 1/sqrt(fan_in)) init.

    Weights are stored as [in, out] (transposed vs. PyTorch's [out, in]) so
    the forward is y = x @ W + b.
    """
    sizes = [(input_size, 64), (64, 32), (32, 1)]
    params = []
    for fan_in, fan_out in sizes:
        key, kw, kb = jax.random.split(key, 3)
        bound = 1.0 / jnp.sqrt(jnp.asarray(fan_in, dtype))
        w = jax.random.uniform(kw, (fan_in, fan_out), dtype, -bound, bound)
        b = jax.random.uniform(kb, (1, fan_out), dtype, -bound, bound)
        params.extend([w, b])
    return tuple(params)


def linear_nn_ref(x, params):
    """Faithful 3-layer pure-JAX reference (matches the PyTorch forward)."""
    w1, b1, w2, b2, w3, b3 = params
    h = x @ w1 + b1
    h = h @ w2 + b2
    return h @ w3 + b3


if __name__ == "__main__":
    key = jax.random.PRNGKey(0)
    input_size = 16  # stands in for X_train_processed.shape[1]
    k_x, k_x2, k_x3, k_p, k_p2 = jax.random.split(key, 5)
    params = init_linear_nn_params(k_p, input_size)

    # (1) small, non-multiple-of-128 batch -> batch padding + single-tile path
    x_small = jax.random.normal(k_x, (200, input_size), dtype=jnp.float32)
    out_small = jax.block_until_ready(linear_nn_forward(x_small, params))
    ref_small = linear_nn_ref(x_small, params)
    assert out_small.shape == (200, 1), out_small.shape
    assert jnp.allclose(out_small, ref_small, rtol=1e-4, atol=1e-4), "mismatch (small batch)"

    # (2) multi-tile path (grid > 1, pipelined / megacore-parallel)
    x_big = jax.random.normal(k_x2, (2048, input_size), dtype=jnp.float32)
    out_big = jax.block_until_ready(linear_nn_forward(x_big, params, batch_tile=1024))
    ref_big = linear_nn_ref(x_big, params)
    assert out_big.shape == (2048, 1), out_big.shape
    assert jnp.allclose(out_big, ref_big, rtol=1e-4, atol=1e-4), "mismatch (big batch)"

    # (3) feature dim that does not divide 128 -> exercises feature padding
    params13 = init_linear_nn_params(k_p2, 13)
    x_odd = jax.random.normal(k_x3, (100, 13), dtype=jnp.float32)
    out_odd = jax.block_until_ready(linear_nn_forward(x_odd, params13))
    ref_odd = linear_nn_ref(x_odd, params13)
    assert out_odd.shape == (100, 1), out_odd.shape
    assert jnp.allclose(out_odd, ref_odd, rtol=1e-4, atol=1e-4), "mismatch (odd in_size)"

    print("KERNEL_OK")
</pallas_src>

<mosaic_0001>
module attributes {stable_mosaic.version = 11 : i64} {
  func.func @_affine_kernel(%arg0: i32, %arg1: memref<32x128xf32, #tpu.memory_space<vmem>>, %arg2: memref<128x8xf32, #tpu.memory_space<vmem>>, %arg3: memref<1x1xf32, #tpu.memory_space<smem>>, %arg4: memref<32x8xf32, #tpu.memory_space<vmem>>) attributes {dimension_semantics = [#tpu.dimension_semantics<parallel>], iteration_bounds = array<i64: 1>, scalar_prefetch = 0 : i64, scratch_operands = 0 : i64, tpu.core_type = #tpu.core_type<tc>, window_params = [{transform_indices = @transform_0, window_bounds = array<i64: 32, 128>}, {pipeline_mode = #tpu.pipeline_mode<synchronous>, transform_indices = @transform_1, window_bounds = array<i64: 128, 8>}, {transform_indices = @transform_2, window_bounds = array<i64: 1, 1>}, {transform_indices = @transform_3, window_bounds = array<i64: 32, 8>}]} {
    %c0 = arith.constant 0 : index
    %c0_0 = arith.constant 0 : index
    %0 = vector.load %arg1[%c0, %c0_0] : memref<32x128xf32, #tpu.memory_space<vmem>>, vector<32x128xf32>
    %c0_1 = arith.constant 0 : index
    %c0_2 = arith.constant 0 : index
    %1 = vector.load %arg2[%c0_1, %c0_2] : memref<128x8xf32, #tpu.memory_space<vmem>>, vector<128x8xf32>
    %cst = arith.constant dense<0.000000e+00> : vector<32x8xf32>
    %2 = tpu.matmul %0, %1, %cst {dimension_numbers = #tpu.dot_dimension_numbers<[1], [0], [0], [1], [0, 0, 1, 1], [], []>, precision = #tpu.contract_precision<fp32>} : vector<32x128xf32>, vector<128x8xf32>, vector<32x8xf32> -> vector<32x8xf32>
    %c0_3 = arith.constant 0 : index
    %c0_4 = arith.constant 0 : index
    %3 = memref.load %arg3[%c0_3, %c0_4] : memref<1x1xf32, #tpu.memory_space<smem>>
    %4 = vector.broadcast %3 : f32 to vector<32x8xf32>
    %5 = arith.addf %2, %4 : vector<32x8xf32>
    %c0_5 = arith.constant 0 : index
    %c0_6 = arith.constant 0 : index
    %6 = vector.load %arg4[%c0_5, %c0_6] : memref<32x8xf32, #tpu.memory_space<vmem>>, vector<32x8xf32>
    tpu.vector_store %arg4[%c0_5, %c0_6], %5 {strides = array<i32>} : memref<32x8xf32, #tpu.memory_space<vmem>>, vector<32x8xf32>,
    return
  }
  func.func @transform_0(%arg0: i32) -> (i32, i32) {
    %c0_i32 = arith.constant 0 : i32
    %c0_i32_0 = arith.constant 0 : i32
    return %arg0, %c0_i32 : i32, i32
  }
  func.func @transform_1(%arg0: i32) -> (i32, i32) {
    %c0_i32 = arith.constant 0 : i32
    %c0_i32_0 = arith.constant 0 : i32
    %c0_i32_1 = arith.constant 0 : i32
    return %c0_i32, %c0_i32_0 : i32, i32
  }
  func.func @transform_2(%arg0: i32) -> (i32, i32) {
    %c0_i32 = arith.constant 0 : i32
    %c0_i32_0 = arith.constant 0 : i32
    %c0_i32_1 = arith.constant 0 : i32
    return %c0_i32, %c0_i32_0 : i32, i32
  }
  func.func @transform_3(%arg0: i32) -> (i32, i32) {
    %c0_i32 = arith.constant 0 : i32
    %c0_i32_0 = arith.constant 0 : i32
    return %arg0, %c0_i32 : i32, i32
  }
}

</mosaic_0001>

<bundles_post_ra>
// kernel: linear_nn_forward.1
= control target key start
LH: loop header
LB: loop body
LE: loop exit
PB: predicated region body
PF: predicated region fallthrough
CT: control target
= control target key end

     0   :  { %vm471_vm0 = vcmask 64512   ;;  %s847_s1 = inlined_call_operand.vmem [shape: f32[128,8], index: 1, kind: input, shape index: {}]   ;;  %s848_s0 = inlined_call_operand.vmem [shape: f32[32,128], index: 0, kind: input, shape index: {}]   ;;  %s849_s2 = inlined_call_operand.<no memory space> [shape: f32[1,1], index: 2, kind: input, shape index: {}]   ;;  %s850_s3 = inlined_call_operand.vmem [shape: f32[32,8], index: 3, kind: output, shape index: {}]  }
   0x1   :  { %v34_v0 = vld [vmem:[%s847_s1 + $0x78] sm:$0xff]  ;;  %v33_v1 = vld [vmem:[%s847_s1 + $0x70] sm:$0xff]  ;;  %v32_v2 = vld [vmem:[%s847_s1 + $0x68] sm:$0xff] }
   0x2   :  { %v541_v3 = vand.u32 4294901760, %v34_v0  ;;  %v543_v4 = vand.u32 4294901760, %v33_v1  ;;  %v545_v5 = vand.u32 4294901760, %v32_v2  ;;  %v31_v6 = vld [vmem:[%s847_s1 + $0x60] sm:$0xff]  ;;  %v30_v7 = vld [vmem:[%s847_s1 + $0x58] sm:$0xff]  ;;  %v29_v8 = vld [vmem:[%s847_s1 + $0x50] sm:$0xff] }
   0x3   :  { %v556_v9 = vand.u32 4294901760, %v31_v6  ;;  %v558_v10 = vand.u32 4294901760, %v30_v7  ;;  %v560_v11 = vand.u32 4294901760, %v29_v8  ;;  %v28_v12 = vld [vmem:[%s847_s1 + $0x48] sm:$0xff]  ;;  %v27_v13 = vld [vmem:[%s847_s1 + $0x40] sm:$0xff]  ;;  %v26_v18 = vld [vmem:[%s847_s1 + $0x38] sm:$0xff] }
   0x4   :  { %38 = vmatpush.msra.mxu0 %v541_v3  ;;  %v103_v14 = vsub.f32 %v34_v0, %v541_v3  ;;  %v109_v15 = vsub.f32 %v33_v1, %v543_v4  ;;  %285 = vmatpush.msra.mxu3 %v541_v3  ;;  %v115_v16 = vsub.f32 %v32_v2, %v545_v5  ;;  %v573_v17 = vand.u32 4294901760, %v28_v12  ;;  %v25_v29 = vld [vmem:[%s847_s1 + $0x30] sm:$0xff]  ;;  %v24_v36 = vld [vmem:[%s847_s1 + $0x28] sm:$0xff]  ;;  %v23_v43 = vld [vmem:[%s847_s1 + $0x20] sm:$0xff] }
   0x5   :  { %v121_v19 = vsub.f32 %v31_v6, %v556_v9  ;;  %v127_v20 = vsub.f32 %v30_v7, %v558_v10  ;;  %v133_v21 = vsub.f32 %v29_v8, %v560_v11  ;;  %v581_v22 = vand.u32 4294901760, %v27_v13  ;;  %v22_v49 = vld [vmem:[%s847_s1 + $0x18] sm:$0xff]  ;;  %v21_v55 = vld [vmem:[%s847_s1 + $0x10] sm:$0xff]  ;;  %v15_v56 = vld [vmem:[%s848_s0] sm:$0xff] }
   0x6   :  { %40 = vmatpush.msra.mxu0 %v543_v4  ;;  %217 = vmatpush.msra.mxu2 %v103_v14  ;;  %v584_v23 = vand.u32 4294901760, %v103_v14  ;;  %v586_v24 = vand.u32 4294901760, %v109_v15  ;;  %v588_v25 = vand.u32 4294901760, %v115_v16  ;;  %v594_v27 = vsub.f32 %v28_v12, %v573_v17  ;;  %v20_v62 = vld [vmem:[%s847_s1 + $0x8] sm:$0xff]  ;;  %v19_v8 = vld [vmem:[%s847_s1] sm:$0xff] }
   0x7   :  { %287 = vmatpush.msra.mxu3 %v543_v4  ;;  %v591_v26 = vand.u32 4294901760, %v121_v19  ;;  %v596_v28 = vand.u32 4294901760, %v26_v18  ;;  %v605_v33 = vand.u32 4294901760, %v127_v20  ;;  %v609_v34 = vsub.f32 %v27_v13, %v581_v22 }
   0x8   :  { %42 = vmatpush.msra.mxu0 %v545_v5  ;;  %220 = vmatpush.msra.mxu2 %v109_v15  ;;  %v105_v30 = vsub.f32 %v103_v14, %v584_v23  ;;  %v111_v31 = vsub.f32 %v109_v15, %v586_v24  ;;  %v117_v32 = vsub.f32 %v115_v16, %v588_v25  ;;  %v611_v35 = vand.u32 4294901760, %v133_v21 }
   0x9   :  { %289 = vmatpush.msra.mxu3 %v545_v5  ;;  %v123_v39 = vsub.f32 %v121_v19, %v591_v26  ;;  %v618_v40 = vand.u32 4294901760, %v25_v29  ;;  %v622_v41 = vsub.f32 %v26_v18, %v596_v28  ;;  %v625_v42 = vand.u32 4294901760, %v594_v27 }
   0xa   :  { %44 = vmatpush.msra.mxu0 %v556_v9  ;;  %223 = vmatpush.msra.mxu2 %v115_v16  ;;  %v106_v37 = vand.u32 4294901760, %v105_v30  ;;  %v112_v38 = vand.u32 4294901760, %v111_v31  ;;  %v118_v44 = vand.u32 4294901760, %v117_v32  ;;  %v129_v45 = vsub.f32 %v127_v20, %v605_v33 }
   0xb   :  { %291 = vmatpush.msra.mxu3 %v556_v9  ;;  %v632_v46 = vand.u32 4294901760, %v24_v36  ;;  %v135_v47 = vsub.f32 %v133_v21, %v611_v35  ;;  %v637_v48 = vand.u32 4294901760, %v609_v34  ;;  %v124_v50 = vand.u32 4294901760, %v123_v39 }
   0xc   :  { %46 = vmatpush.msra.mxu0 %v558_v10  ;;  %107 = vmatpush.msra.mxu1 %v106_v37  ;;  %v157_v51 = vsub.f32 %v25_v29, %v618_v40  ;;  %v644_v52 = vand.u32 4294901760, %v23_v43  ;;  %v141_v53 = vsub.f32 %v594_v27, %v625_v42  ;;  %v650_v54 = vand.u32 4294901760, %v622_v41 }
   0xd   :  { %226 = vmatpush.msra.mxu2 %v121_v19  ;;  %293 = vmatpush.msra.mxu3 %v558_v10  ;;  %v130_v57 = vand.u32 4294901760, %v129_v45  ;;  %v163_v58 = vsub.f32 %v24_v36, %v632_v46  ;;  %v660_v59 = vand.u32 4294901760, %v22_v49  ;;  %v136_v60 = vand.u32 4294901760, %v135_v47 }
   0xe   :  { %48 = vmatpush.msra.mxu0 %v560_v11  ;;  %113 = vmatpush.msra.mxu1 %v112_v38  ;;  %v147_v61 = vsub.f32 %v609_v34, %v637_v48  ;;  %v169_v63 = vsub.f32 %v23_v43, %v644_v52  ;;  %v670_v0 = vand.u32 4294901760, %v21_v55  ;;  %v672_v1 = vand.u32 4294901760, %v157_v51 }
   0xf   :  { %229 = vmatpush.msra.mxu2 %v127_v20  ;;  %295 = vmatpush.msra.mxu3 %v560_v11  ;;  %v674_v2 = vand.u32 4294901760, %v15_v56  ;;  %v142_v6 = vand.u32 4294901760, %v141_v53  ;;  %v153_v7 = vsub.f32 %v622_v41, %v650_v54  ;;  %v175_v12 = vsub.f32 %v22_v49, %v660_v59 }
  0x10   :  { %50 = vmatpush.msra.mxu0 %v573_v17  ;;  %119 = vmatpush.msra.mxu1 %v118_v44  ;;  %v685_v13 = vand.u32 4294901760, %v20_v62  ;;  %v687_v14 = vand.u32 4294901760, %v163_v58  ;;  %v148_v16 = vand.u32 4294901760, %v147_v61  ;;  %v159_v18 = vsub.f32 %v157_v51, %v672_v1 }
  0x11   :  { %232 = vmatpush.msra.mxu2 %v133_v21  ;;  %297 = vmatpush.msra.mxu3 %v573_v17  ;;  %v690_v15 = vsub.f32 %v15_v56, %v674_v2  ;;  %v181_v19 = vsub.f32 %v21_v55, %v670_v0  ;;  %v697_v20 = vand.u32 4294901760, %v19_v8  ;;  %v699_v21 = vand.u32 4294901760, %v169_v63  ;;  %v17_v56 = vld [vmem:[%s848_s0 + $0x10] sm:$0xff] }
  0x12   :  { %52 = vmatpush.msra.mxu0 %v581_v22  ;;  %125 = vmatpush.msra.mxu1 %v124_v50  ;;  %v154_v30 = vand.u32 4294901760, %v153_v7  ;;  %v165_v31 = vsub.f32 %v163_v58, %v687_v14  ;;  %v187_v32 = vsub.f32 %v20_v62, %v685_v13  ;;  %v160_v37 = vand.u32 4294901760, %v159_v18  ;;  %v18_v18 = vld [vmem:[%s848_s0 + $0x18] sm:$0xff] }
  0x13   :  { %235 = vmatpush.msra.mxu2 %v594_v27  ;;  %299 = vmatpush.msra.mxu3 %v581_v22  ;;  %v16_v27 = vld [vmem:[%s848_s0 + $0x8] sm:$0xff]  ;;  %v71_v29 = vand.u32 4294901760, %v690_v15  ;;  %v171_v38 = vsub.f32 %v169_v63, %v699_v21  ;;  %v193_v39 = vsub.f32 %v19_v8, %v697_v20 }
  0x14   :  { %54 = vmatpush.msra.mxu0 %v596_v28  ;;  %131 = vmatpush.msra.mxu1 %v130_v57  ;;  %v713_v36 = vand.u32 4294901760, %v16_v27  ;;  %v166_v44 = vand.u32 4294901760, %v165_v31  ;;  %v724_v47 = vand.u32 4294901760, %v187_v32 }
  0x15   :  { %238 = vmatpush.msra.mxu2 %v609_v34  ;;  %301 = vmatpush.msra.mxu3 %v596_v28  ;;  %v710_v34 = vand.u32 4294901760, %v175_v12  ;;  %v72_v43 = vsub.f32 %v690_v15, %v71_v29  ;;  %v172_v50 = vand.u32 4294901760, %v171_v38  ;;  %v730_v53 = vand.u32 4294901760, %v193_v39 }
  0x16   :  { %56 = vmatpush.msra.mxu0 %v618_v40  ;;  %137 = vmatpush.msra.mxu1 %v136_v60  ;;  %v78_v49 = vsub.f32 %v16_v27, %v713_v36 }
  0x17   :  { %241 = vmatpush.msra.mxu2 %v622_v41  ;;  %303 = vmatpush.msra.mxu3 %v618_v40  ;;  %v718_v41 = vand.u32 4294901760, %v181_v19  ;;  %v177_v45 = vsub.f32 %v175_v12, %v710_v34  ;;  %v73_v55 = vand.u32 4294901760, %v72_v43  ;;  %v195_v62 = vsub.f32 %v193_v39, %v730_v53 }
  0x18   :  { %58 = vmatpush.msra.mxu0 %v632_v46  ;;  %143 = vmatpush.msra.mxu1 %v142_v6  ;;  %v79_v60 = vand.u32 4294901760, %v78_v49 }
  0x19   :  { %244 = vmatpush.msra.mxu2 %v157_v51  ;;  %305 = vmatpush.msra.mxu3 %v632_v46  ;;  %v183_v51 = vsub.f32 %v181_v19, %v718_v41  ;;  %v178_v57 = vand.u32 4294901760, %v177_v45  ;;  %v196_v8 = vand.u32 4294901760, %v195_v62 }
  0x1a   :  { %60 = vmatpush.msra.mxu0 %v644_v52  ;;  %149 = vmatpush.msra.mxu1 %v148_v16  ;;  %v80_v7 = vsub.f32 %v78_v49, %v79_v60 }
  0x1b   :  { %247 = vmatpush.msra.mxu2 %v163_v58  ;;  %307 = vmatpush.msra.mxu3 %v644_v52  ;;  %v189_v58 = vsub.f32 %v187_v32, %v724_v47  ;;  %v184_v61 = vand.u32 4294901760, %v183_v51 }
  0x1c   :  { %62 = vmatpush.msra.mxu0 %v660_v59  ;;  %155 = vmatpush.msra.mxu1 %v154_v30  ;;  %v81_v16 = vand.u32 4294901760, %v80_v7 }
  0x1d   :  { %250 = vmatpush.msra.mxu2 %v169_v63  ;;  %309 = vmatpush.msra.mxu3 %v660_v59  ;;  %v741_v63 = vand.u32 4294901760, %v17_v56  ;;  %v190_v6 = vand.u32 4294901760, %v189_v58 }
  0x1e   :  { %64 = vmatpush.msra.mxu0 %v670_v0  ;;  %161 = vmatpush.msra.mxu1 %v160_v37 }
  0x1f   :  { %253 = vmatpush.msra.mxu2 %v175_v12  ;;  %311 = vmatpush.msra.mxu3 %v670_v0  ;;  %v86_v12 = vsub.f32 %v17_v56, %v741_v63 }
  0x20   :  { %66 = vmatpush.msra.mxu0 %v685_v13  ;;  %167 = vmatpush.msra.mxu1 %v166_v44 }
  0x21   :  { %256 = vmatpush.msra.mxu2 %v181_v19  ;;  %313 = vmatpush.msra.mxu3 %v685_v13 }
  0x22   :  { %68 = vmatpush.msra.mxu0 %v697_v20  ;;  %173 = vmatpush.msra.mxu1 %v172_v50 }
  0x23   :  { %259 = vmatpush.msra.mxu2 %v187_v32  ;;  %74 = vmatmul.f32.vlgmr.msra.gmra.mxu0 %v73_v55 }
  0x24   :  { %179 = vmatpush.msra.mxu1 %v178_v57  ;;  %344 = vmatpush.msrb.mxu0 %v584_v23 }
  0x25   :  { %262 = vmatpush.msra.mxu2 %v193_v39  ;;  %315 = vmatpush.msra.mxu3 %v697_v20 }
  0x26   :  { %265 = vmatmul.f32.vlgmr.msra.gmra.mxu2 %v690_v15  ;;  %185 = vmatpush.msra.mxu1 %v184_v61  ;;  %v87_v15 = vand.u32 4294901760, %v86_v12 }
  0x27   :  { %480 = vmatpush.msrb.mxu2 %v584_v23  ;;  %348 = vmatpush.msrb.mxu0 %v586_v24  ;;  %v759_v23 = vand.u32 4294901760, %v18_v18 }
  0x28   :  { %319 = vmatmul.f32.vlgmr.msra.gmra.mxu3 %v71_v29  ;;  %191 = vmatpush.msra.mxu1 %v190_v6 }
  0x29   :  { %481 = vmatpush.msrb.mxu2 %v586_v24  ;;  %496 = vmatpush.msrb.mxu3 %v541_v3  ;;  %v88_v24 = vsub.f32 %v86_v12, %v87_v15 }
  0x2a   :  { %352 = vmatpush.msrb.mxu0 %v588_v25  ;;  %197 = vmatpush.msra.mxu1 %v196_v8 }
  0x2b   :  { %482 = vmatpush.msrb.mxu2 %v588_v25  ;;  %497 = vmatpush.msrb.mxu3 %v543_v4  ;;  %v94_v25 = vsub.f32 %v18_v18, %v759_v23 }
  0x2c   :  { %356 = vmatpush.msrb.mxu0 %v591_v26  ;;  %199 = vmatmul.f32.vlgmr.msra.gmra.mxu1 %v674_v2 }
  0x2d   :  { %82 = vmatmul.f32.gmra.mxu0 %v81_v16  ;;  %483 = vmatpush.msrb.mxu2 %v591_v26  ;;  %v89_v26 = vand.u32 4294901760, %v88_v24 }
  0x2e   :  { %498 = vmatpush.msrb.mxu3 %v545_v5  ;;  %360 = vmatpush.msrb.mxu0 %v605_v33 }
  0x2f   :  { %423 = vmatpush.msrb.mxu1 %v541_v3  ;;  %270 = vmatmul.f32.gmra.mxu2 %v78_v49  ;;  %v95_v3 = vand.u32 4294901760, %v94_v25 }
  0x30   :  { %484 = vmatpush.msrb.mxu2 %v605_v33  ;;  %499 = vmatpush.msrb.mxu3 %v556_v9 }
  0x31   :  { %364 = vmatpush.msrb.mxu0 %v611_v35  ;;  %425 = vmatpush.msrb.mxu1 %v543_v4  ;;  %v96_v4 = vsub.f32 %v94_v25, %v95_v3 }
  0x32   :  { %325 = vmatmul.f32.gmra.mxu3 %v79_v60  ;;  %485 = vmatpush.msrb.mxu2 %v611_v35 }
  0x33   :  { %500 = vmatpush.msrb.mxu3 %v558_v10  ;;  %368 = vmatpush.msrb.mxu0 %v625_v42 }
  0x34   :  { %427 = vmatpush.msrb.mxu1 %v545_v5  ;;  %486 = vmatpush.msrb.mxu2 %v625_v42  ;;  %v97_v5 = vand.u32 4294901760, %v96_v4 }
  0x35   :  { %501 = vmatpush.msrb.mxu3 %v560_v11  ;;  %372 = vmatpush.msrb.mxu0 %v637_v48 }
  0x36   :  { %429 = vmatpush.msrb.mxu1 %v556_v9  ;;  %90 = vmatmul.f32.gmra.mxu0 %v89_v26 }
  0x37   :  { %203 = vmatmul.f32.gmra.mxu1 %v713_v36  ;;  %487 = vmatpush.msrb.mxu2 %v637_v48  ;;  %v36_v48 = vstv %s849_s2 }
  0x38   :  { %502 = vmatpush.msrb.mxu3 %v573_v17  ;;  %376 = vmatpush.msrb.mxu0 %v650_v54 }
  0x39   :  { %431 = vmatpush.msrb.mxu1 %v558_v10  ;;  %275 = vmatmul.f32.gmra.mxu2 %v86_v12 }
  0x3a   :  { %488 = vmatpush.msrb.mxu2 %v650_v54  ;;  %503 = vmatpush.msrb.mxu3 %v581_v22 }
  0x3b   :  { %380 = vmatpush.msrb.mxu0 %v672_v1  ;;  %433 = vmatpush.msrb.mxu1 %v560_v11 }
  0x3c   :  { %331 = vmatmul.f32.gmra.mxu3 %v87_v15  ;;  %489 = vmatpush.msrb.mxu2 %v672_v1 }
  0x3d   :  { %504 = vmatpush.msrb.mxu3 %v596_v28  ;;  %384 = vmatpush.msrb.mxu0 %v687_v14 }
  0x3e   :  { %435 = vmatpush.msrb.mxu1 %v573_v17  ;;  %490 = vmatpush.msrb.mxu2 %v687_v14 }
  0x3f   :  { %505 = vmatpush.msrb.mxu3 %v618_v40  ;;  %388 = vmatpush.msrb.mxu0 %v699_v21 }
  0x40   :  { %437 = vmatpush.msrb.mxu1 %v581_v22  ;;  %98 = vmatmul.f32.gmra.mxu0 %v97_v5 }
  0x41   :  { %207 = vmatmul.f32.gmra.mxu1 %v741_v63  ;;  %491 = vmatpush.msrb.mxu2 %v699_v21 }
  0x42   :  { %506 = vmatpush.msrb.mxu3 %v632_v46  ;;  %392 = vmatpush.msrb.mxu0 %v710_v34 }
  0x43   :  { %439 = vmatpush.msrb.mxu1 %v596_v28  ;;  %280 = vmatmul.f32.gmra.mxu2 %v94_v25 }
  0x44   :  { %492 = vmatpush.msrb.mxu2 %v710_v34  ;;  %507 = vmatpush.msrb.mxu3 %v644_v52 }
  0x45   :  { %396 = vmatpush.msrb.mxu0 %v718_v41  ;;  %441 = vmatpush.msrb.mxu1 %v618_v40 }
  0x46   :  { %337 = vmatmul.f32.gmra.mxu3 %v95_v3  ;;  %493 = vmatpush.msrb.mxu2 %v718_v41 }
  0x47   :  { %508 = vmatpush.msrb.mxu3 %v660_v59  ;;  %400 = vmatpush.msrb.mxu0 %v724_v47 }
  0x48   :  { %443 = vmatpush.msrb.mxu1 %v632_v46  ;;  %494 = vmatpush.msrb.mxu2 %v724_v47 }
  0x49   :  { %509 = vmatpush.msrb.mxu3 %v670_v0  ;;  %404 = vmatpush.msrb.mxu0 %v730_v53 }
  0x4a   :  { %445 = vmatpush.msrb.mxu1 %v644_v52  ;;  %495 = vmatpush.msrb.mxu2 %v730_v53 }
  0x4b   :  { %211 = vmatmul.f32.gmra.mxu1 %v759_v23  ;;  %406 = vmatmul.f32.vlgmr.msrb.gmra.mxu0 %v674_v2 }
  0x4c   :  { %510 = vmatpush.msrb.mxu3 %v685_v13  ;;  %447 = vmatpush.msrb.mxu1 %v660_v59 }
  0x4d   :  { %414 = vmatmul.f32.vlgmr.msrb.gmra.mxu2 %v741_v63 }
  0x4e   :  { %511 = vmatpush.msrb.mxu3 %v697_v20  ;;  %449 = vmatpush.msrb.mxu1 %v670_v0 }
  0x4f   :  { %463 = vmatmul.f32.vlgmr.msrb.gmra.mxu3 %v741_v63 }
  0x50   :  { %451 = vmatpush.msrb.mxu1 %v685_v13 }
  0x52   :  { %453 = vmatpush.msrb.mxu1 %v697_v20 }
  0x53   :  { %410 = vmatmul.f32.gmra.mxu0 %v713_v36  ;;  %455 = vmatmul.f32.vlgmr.msrb.gmra.mxu1 %v674_v2 }
  0x55   :  { %418 = vmatmul.f32.gmra.mxu2 %v759_v23 }
  0x57   :  { %467 = vmatmul.f32.gmra.mxu3 %v759_v23 }
  0x5b   :  { %459 = vmatmul.f32.gmra.mxu1 %v713_v36 }
  0xa0   :  { %v75_v9 = vpop.f32.mrf.mxu0 }
  0xa1   :  { %v76_v59 = vadd.f32 %v75_v9, %v36_v48 }
  0xa9   :  { %v266_v10 = vpop.f32.mrf.mxu2  ;;  %v200_v11 = vpop.f32.mrf.mxu1 }
  0xaa   :  { %v83_v22 = vpop.f32.mrf.mxu0  ;;  %v201_v1 = vadd.f32 %v200_v11, %v76_v59 }
  0xab   :  { %v320_v17 = vpop.f32.mrf.mxu3  ;;  %v84_v20 = vadd.f32 %v83_v22, %v36_v48 }
  0xac   :  { %v267_v21 = vadd.f32 %v266_v10, %v201_v1 }
  0xae   :  { %v321_v31 = vadd.f32 %v320_v17, %v267_v21 }
  0xb2   :  { %v271_v28 = vpop.f32.mrf.mxu2 }
  0xb3   :  { %v91_v40 = vpop.f32.mrf.mxu0 }
  0xb4   :  { %v204_v33 = vpop.f32.mrf.mxu1  ;;  %v92_v0 = vadd.f32 %v91_v40, %v36_v48 }
  0xb5   :  { %v326_v35 = vpop.f32.mrf.mxu3  ;;  %v205_v32 = vadd.f32 %v204_v33, %v84_v20 }
  0xb7   :  { %v272_v43 = vadd.f32 %v271_v28, %v205_v32 }
  0xb9   :  { %v327_v51 = vadd.f32 %v326_v35, %v272_v43 }
  0xbc   :  { %v276_v42 = vpop.f32.mrf.mxu2 }
  0xbd   :  { %v99_v54 = vpop.f32.mrf.mxu0 }
  0xbe   :  { %v208_v46 = vpop.f32.mrf.mxu1  ;;  %v100_v27 = vadd.f32 %v99_v54, %v36_v48 }
  0xbf   :  { %v332_v52 = vpop.f32.mrf.mxu3  ;;  %v209_v13 = vadd.f32 %v208_v46, %v92_v0 }
  0xc1   :  { %v277_v29 = vadd.f32 %v276_v42, %v209_v13 }
  0xc3   :  { %v333_v34 = vadd.f32 %v332_v52, %v277_v29 }
  0xc6   :  { %v281_v2 = vpop.f32.mrf.mxu2 }
  0xc8   :  { %v212_v14 = vpop.f32.mrf.mxu1  ;;  %v407_v30 = vpop.f32.mrf.mxu0 }
  0xc9   :  { %v338_v19 = vpop.f32.mrf.mxu3  ;;  %v213_v36 = vadd.f32 %v212_v14, %v100_v27  ;;  %v408_v37 = vadd.f32 %v407_v30, %v321_v31 }
  0xcb   :  { %v282_v47 = vadd.f32 %v281_v2, %v213_v36 }
  0xcd   :  { %v339_v53 = vadd.f32 %v338_v19, %v282_v47 }
  0xd0   :  { %v415_v38 = vpop.f32.mrf.mxu2  ;;  %v456_v41 = vpop.f32.mrf.mxu1 }
  0xd1   :  { %v416_v39 = vadd.f32 %v415_v38, %v333_v34  ;;  %v457_v44 = vadd.f32 %v456_v41, %v408_v37  ;;  %v411_v50 = vpop.f32.mrf.mxu0 }
  0xd2   :  { %v464_v45 = vpop.f32.mrf.mxu3  ;;  %v412_v55 = vadd.f32 %v411_v50, %v327_v51 }
  0xd3   :  { %v465_v49 = vadd.f32 %v464_v45, %v416_v39  ;;  %472 = vst.msk [vmem:[%s850_s3] sm:$0xff] %vm471_vm0, %v457_v44 }
  0xd5   :  { %474 = vst.msk [vmem:[%s850_s3 + $0x10] sm:$0xff] %vm471_vm0, %v465_v49 }
  0xd8   :  { %v419_v56 = vpop.f32.mrf.mxu2  ;;  %v460_v58 = vpop.f32.mrf.mxu1 }
  0xd9   :  { %v420_v57 = vadd.f32 %v419_v56, %v339_v53  ;;  %v461_v60 = vadd.f32 %v460_v58, %v412_v55 }
  0xda   :  { %v468_v61 = vpop.f32.mrf.mxu3 }
  0xdb   :  { %v469_v62 = vadd.f32 %v468_v61, %v420_v57  ;;  %473 = vst.msk [vmem:[%s850_s3 + $0x8] sm:$0xff] %vm471_vm0, %v461_v60 }
  0xdd   :  { %475 = vst.msk [vmem:[%s850_s3 + $0x18] sm:$0xff] %vm471_vm0, %v469_v62 }

</bundles_post_ra>
